<compile_context>
chip_gen: v5e
topology: v5e:2x2
jax: 0.10.0
libtpu: 0.0.40
codegen_flags: <defaults>
</compile_context>

<pallas_src>
import functools

import jax
import jax.numpy as jnp
from jax.experimental import pallas as pl
from jax.experimental.pallas import tpu as pltpu

BN_EPS = 1e-5


def mlp_kernel(x_ref, w1_ref, gb_ref, w2_ref, b2_ref, out_ref):
    h_step = pl.program_id(1)

    # Output block is resident across the H (accumulation) axis: init at h==0.
    @pl.when(h_step == 0)
    def _():
        out_ref[...] = jnp.zeros_like(out_ref)

    # ---- Linear 1 (bias=False): bf16 operands, fp32 MXU accumulation --------
    h = jnp.dot(x_ref[...], w1_ref[...], preferred_element_type=jnp.float32)

    # ---- BatchNorm1d (training-mode batch stats, biased var) ----------------
    # Single reduction pass: mean and E[h^2]; stays fp32.  Clamp var >= 0 to
    # avoid rsqrt(NaN) from catastrophic cancellation.
    inv_b = 1.0 / x_ref.shape[0]
    mean = jnp.sum(h, axis=0, keepdims=True) * inv_b           # (1, TH)
    ex2 = jnp.sum(h * h, axis=0, keepdims=True) * inv_b        # (1, TH)
    var = jnp.maximum(ex2 - mean * mean, 0.0)
    gamma = gb_ref[0:1, :]                                     # (1, TH)
    beta = gb_ref[1:2, :]                                      # (1, TH)
    s = gamma * jax.lax.rsqrt(var + BN_EPS)                    # fused scale
    t = beta - mean * s                                        # fused shift

    # ---- fused BN affine + ReLU ---------------------------------------------
    h = jnp.maximum(h * s + t, 0.0)

    # ---- Linear 2 partial product over this H block, fp32 accumulation ------
    out_ref[...] += jnp.dot(h.astype(jnp.bfloat16), w2_ref[...],
                            preferred_element_type=jnp.float32)

    # ---- finalize: add bias on the last H step -------------------------------
    @pl.when(h_step == pl.num_programs(1) - 1)
    def _():
        out_ref[...] += b2_ref[...]


def _aligned_divisor_candidates(dim, max_tile, align=128):
    """128-aligned divisors of `dim` that are <= max_tile, largest first."""
    cands = [t for t in range(align, min(dim, max_tile) + 1, align)
             if dim % t == 0]
    if not cands:
        # No aligned divisor (small or awkward dim): use the full dimension.
        cands = [dim]
    return sorted(cands, reverse=True)


def _footprint_bytes(B, D_in, to, th, x_item, w_item):
    """Conservative VMEM footprint for one grid step (default double-buffering)."""
    return (2 * B * D_in * x_item        # x (grid-invariant, but 2 bufs alloc'd)
            + 2 * B * to * 4             # fp32 output block
            + 2 * D_in * th * w_item     # W1 tile
            + 2 * 8 * th * 4             # stacked gamma/beta tile (8-sublane pad)
            + 2 * th * to * w_item       # W2 tile
            + 2 * 8 * to * 4)            # bias tile (8-sublane pad)


@functools.partial(jax.jit, static_argnames=("block_h", "block_o"))
def mlp_forward(x, w1_t, gb, w2_t, b2, *, block_h=1024, block_o=512):
    B, D_in = x.shape
    H = w1_t.shape[1]
    O = w2_t.shape[1]
    x_item = x.dtype.itemsize
    w_item = w1_t.dtype.itemsize

    # ---- per-generation VMEM budget (~75% of physical, fallback 48 MiB) -----
    try:
        phys_vmem = int(pltpu.get_tpu_info().vmem_capacity_bytes)
    except Exception:
        phys_vmem = 64 << 20
    vmem_cap = max(int(phys_vmem) * 3 // 4, 8 << 20)

    # ---- tile selection: largest 128-aligned divisors that fit the budget ---
    to = _aligned_divisor_candidates(O, block_o)[0]
    th = None
    for cand in _aligned_divisor_candidates(H, block_h):
        if _footprint_bytes(B, D_in, to, cand, x_item, w_item) <= vmem_cap:
            th = cand
            break
    if th is None:
        th = _aligned_divisor_candidates(H, block_h)[-1]   # smallest candidate
    n_h = H // th
    n_o = O // to

    footprint = _footprint_bytes(B, D_in, to, th, x_item, w_item)
    vmem_limit = int(min(max(2 * footprint, 8 << 20), vmem_cap))

    # Advisory cost estimate (W1 / BN params are re-read once per O tile).
    flops = 2 * B * D_in * H * n_o + 2 * B * H * O
    bytes_accessed = (
        x.size * x_item
        + n_o * w1_t.size * w_item
        + w2_t.size * w_item
        + n_o * gb.size * 4
        + b2.size * 4
        + B * O * 4
    )

    return pl.pallas_call(
        mlp_kernel,
        out_shape=jax.ShapeDtypeStruct((B, O), jnp.float32),
        grid_spec=pltpu.PrefetchScalarGridSpec(
            num_scalar_prefetch=0,
            grid=(n_o, n_h),
            in_specs=[
                pl.BlockSpec((B, D_in), lambda o, h: (0, 0)),   # x (resident)
                pl.BlockSpec((D_in, th), lambda o, h: (0, h)),  # W1^T H-block
                pl.BlockSpec((2, th), lambda o, h: (0, h)),     # [gamma; beta]
                pl.BlockSpec((th, to), lambda o, h: (h, o)),    # W2^T tile
                pl.BlockSpec((1, to), lambda o, h: (0, o)),     # b2 O-block
            ],
            out_specs=pl.BlockSpec((B, to), lambda o, h: (0, o)),  # acc output
        ),
        compiler_params=pltpu.CompilerParams(
            dimension_semantics=("parallel", "arbitrary"),
            vmem_limit_bytes=vmem_limit,
        ),
        cost_estimate=pl.CostEstimate(
            flops=flops, transcendentals=H * n_o, bytes_accessed=bytes_accessed),
    )(x, w1_t, gb, w2_t, b2)


def reference_forward(x, w1_t, gamma, beta, w2_t, b2):
    """Pure-JAX reference.  Matches the module semantics; if fed bf16 operands
    it also matches the kernel's mixed-precision scheme (fp32 stats/accum)."""
    h = jnp.dot(x, w1_t, preferred_element_type=jnp.float32)
    mean = jnp.mean(h, axis=0, keepdims=True)
    var = jnp.mean(h * h, axis=0, keepdims=True) - mean * mean
    h = (h - mean) * jax.lax.rsqrt(var + BN_EPS) * gamma + beta
    h = jnp.maximum(h, 0.0).astype(x.dtype)
    return jnp.dot(h, w2_t, preferred_element_type=jnp.float32) + b2


if __name__ == "__main__":
    # Small, (8,128)-friendly shapes consistent with the module's forward.
    B, D_IN, D_HID, D_OUT = 8, 256, 512, 256

    key = jax.random.PRNGKey(0)
    kx, kw1, kw2, kb2, kg, kb = jax.random.split(key, 6)

    x = jax.random.normal(kx, (B, D_IN), dtype=jnp.float32)

    # PyTorch Linear weight is (out, in); build that way, then transpose once.
    w1 = jax.random.normal(kw1, (D_HID, D_IN), dtype=jnp.float32) * (D_IN ** -0.5)
    w2 = jax.random.normal(kw2, (D_OUT, D_HID), dtype=jnp.float32) * (D_HID ** -0.5)
    b2 = jax.random.normal(kb2, (D_OUT,), dtype=jnp.float32) * 0.01
    gamma = 1.0 + 0.1 * jax.random.normal(kg, (D_HID,), dtype=jnp.float32)
    beta = 0.1 * jax.random.normal(kb, (D_HID,), dtype=jnp.float32)

    # One-time weight/activation prep OUTSIDE the hot path: transpose to
    # (in, out), cast matmul operands to bf16, stack BN params to (2, H).
    x_bf = x.astype(jnp.bfloat16)
    w1_t = jnp.transpose(w1).astype(jnp.bfloat16)          # (D_IN, D_HID)
    w2_t = jnp.transpose(w2).astype(jnp.bfloat16)          # (D_HID, D_OUT)
    gb = jnp.stack([gamma, beta], axis=0)                  # (2, D_HID), fp32
    b2_2d = b2.reshape(1, D_OUT)

    # block_h=256 -> 2 accumulation steps; block_o=128 -> 2 parallel O tiles:
    # exercises both the streamed/accumulated path and the parallel axis.
    out = mlp_forward(x_bf, w1_t, gb, w2_t, b2_2d, block_h=256, block_o=128)
    out = jax.block_until_ready(out)
    assert out.shape == (B, D_OUT)

    gamma2d = gamma.reshape(1, D_HID)
    beta2d = beta.reshape(1, D_HID)

    # (1) tight check vs a reference using the SAME mixed precision
    ref_bf16 = reference_forward(x_bf, w1_t, gamma2d, beta2d, w2_t, b2_2d)
    assert jnp.allclose(out, ref_bf16, atol=1e-2, rtol=1e-2), \
        "mismatch vs bf16-matched reference"

    # (2) looser check vs the full-fp32 module semantics
    ref_f32 = reference_forward(x, jnp.transpose(w1), gamma2d, beta2d,
                                jnp.transpose(w2), b2_2d)
    assert jnp.allclose(out, ref_f32, atol=6e-2, rtol=6e-2), \
        "mismatch vs fp32 reference"

    print("KERNEL_OK")
</pallas_src>

<mosaic_0001>
module attributes {stable_mosaic.version = 11 : i64} {
  func.func @mlp_kernel(%arg0: i32, %arg1: i32, %arg2: memref<8x256xbf16, #tpu.memory_space<vmem>>, %arg3: memref<256x256xbf16, #tpu.memory_space<vmem>>, %arg4: memref<2x256xf32, #tpu.memory_space<vmem>>, %arg5: memref<256x128xbf16, #tpu.memory_space<vmem>>, %arg6: memref<1x128xf32, #tpu.memory_space<vmem>>, %arg7: memref<8x128xf32, #tpu.memory_space<vmem>>) attributes {dimension_semantics = [#tpu.dimension_semantics<parallel>, #tpu.dimension_semantics<arbitrary>], iteration_bounds = array<i64: 2, 2>, scalar_prefetch = 0 : i64, scratch_operands = 0 : i64, tpu.core_type = #tpu.core_type<tc>, window_params = [{pipeline_mode = #tpu.pipeline_mode<synchronous>, transform_indices = @transform_0, window_bounds = array<i64: 8, 256>}, {transform_indices = @transform_1, window_bounds = array<i64: 256, 256>}, {transform_indices = @transform_2, window_bounds = array<i64: 2, 256>}, {transform_indices = @transform_3, window_bounds = array<i64: 256, 128>}, {transform_indices = @transform_4, window_bounds = array<i64: 1, 128>}, {transform_indices = @transform_5, window_bounds = array<i64: 8, 128>}]} {
    %c0_i32 = arith.constant 0 : i32
    %0 = arith.cmpi eq, %arg1, %c0_i32 : i32
    %1 = arith.extui %0 : i1 to i32
    %c0_i32_0 = arith.constant 0 : i32
    %2 = arith.cmpi ne, %1, %c0_i32_0 : i32
    scf.if %2 {
      %cst_22 = arith.constant 0.000000e+00 : f32
      %42 = vector.broadcast %cst_22 : f32 to vector<8x128xf32>
      %c0_23 = arith.constant 0 : index
      %c0_24 = arith.constant 0 : index
      %43 = vector.load %arg7[%c0_23, %c0_24] : memref<8x128xf32, #tpu.memory_space<vmem>>, vector<8x128xf32>
      tpu.vector_store %arg7[%c0_23, %c0_24], %42 {strides = array<i32>} : memref<8x128xf32, #tpu.memory_space<vmem>>, vector<8x128xf32>,
    } else {
    }
    %c0 = arith.constant 0 : index
    %c0_1 = arith.constant 0 : index
    %3 = vector.load %arg2[%c0, %c0_1] : memref<8x256xbf16, #tpu.memory_space<vmem>>, vector<8x256xbf16>
    %c0_2 = arith.constant 0 : index
    %c0_3 = arith.constant 0 : index
    %4 = vector.load %arg3[%c0_2, %c0_3] : memref<256x256xbf16, #tpu.memory_space<vmem>>, vector<256x256xbf16>
    %cst = arith.constant dense<0.000000e+00> : vector<8x256xf32>
    %5 = tpu.matmul %3, %4, %cst {dimension_numbers = #tpu.dot_dimension_numbers<[1], [0], [0], [1], [0, 0, 1, 1], [], []>} : vector<8x256xbf16>, vector<256x256xbf16>, vector<8x256xf32> -> vector<8x256xf32>
    %cst_4 = arith.constant dense<0.000000e+00> : vector<256xf32>
    %6 = vector.multi_reduction <add>, %5, %cst_4 [0] : vector<8x256xf32> to vector<256xf32>
    %7 = vector.shape_cast %6 : vector<256xf32> to vector<1x256xf32>
    %cst_5 = arith.constant 1.250000e-01 : f32
    %8 = vector.broadcast %cst_5 : f32 to vector<1x256xf32>
    %9 = arith.mulf %7, %8 : vector<1x256xf32>
    %10 = arith.mulf %5, %5 : vector<8x256xf32>
    %cst_6 = arith.constant dense<0.000000e+00> : vector<256xf32>
    %11 = vector.multi_reduction <add>, %10, %cst_6 [0] : vector<8x256xf32> to vector<256xf32>
    %12 = vector.shape_cast %11 : vector<256xf32> to vector<1x256xf32>
    %cst_7 = arith.constant 1.250000e-01 : f32
    %13 = vector.broadcast %cst_7 : f32 to vector<1x256xf32>
    %14 = arith.mulf %12, %13 : vector<1x256xf32>
    %15 = arith.mulf %9, %9 : vector<1x256xf32>
    %16 = arith.subf %14, %15 : vector<1x256xf32>
    %cst_8 = arith.constant 0.000000e+00 : f32
    %17 = vector.broadcast %cst_8 : f32 to vector<1x256xf32>
    %18 = arith.maximumf %16, %17 : vector<1x256xf32>
    %c0_9 = arith.constant 0 : index
    %c0_10 = arith.constant 0 : index
    %19 = vector.load %arg4[%c0_9, %c0_10] : memref<2x256xf32, #tpu.memory_space<vmem>>, vector<1x256xf32>
    %c1 = arith.constant 1 : index
    %c0_11 = arith.constant 0 : index
    %20 = vector.load %arg4[%c1, %c0_11] : memref<2x256xf32, #tpu.memory_space<vmem>>, vector<1x256xf32>
    %cst_12 = arith.constant 9.99999974E-6 : f32
    %21 = vector.broadcast %cst_12 : f32 to vector<1x256xf32>
    %22 = arith.addf %18, %21 : vector<1x256xf32>
    %23 = math.rsqrt %22 : vector<1x256xf32>
    %24 = arith.mulf %19, %23 : vector<1x256xf32>
    %25 = arith.mulf %9, %24 : vector<1x256xf32>
    %26 = arith.subf %20, %25 : vector<1x256xf32>
    %27 = vector.broadcast %24 : vector<1x256xf32> to vector<8x256xf32>
    %28 = arith.mulf %5, %27 : vector<8x256xf32>
    %29 = vector.broadcast %26 : vector<1x256xf32> to vector<8x256xf32>
    %30 = arith.addf %28, %29 : vector<8x256xf32>
    %cst_13 = arith.constant 0.000000e+00 : f32
    %31 = vector.broadcast %cst_13 : f32 to vector<8x256xf32>
    %32 = arith.maximumf %30, %31 : vector<8x256xf32>
    %c0_14 = arith.constant 0 : index
    %c0_15 = arith.constant 0 : index
    %33 = vector.load %arg7[%c0_14, %c0_15] : memref<8x128xf32, #tpu.memory_space<vmem>>, vector<8x128xf32>
    %34 = arith.truncf %32 : vector<8x256xf32> to vector<8x256xbf16>
    %c0_16 = arith.constant 0 : index
    %c0_17 = arith.constant 0 : index
    %35 = vector.load %arg5[%c0_16, %c0_17] : memref<256x128xbf16, #tpu.memory_space<vmem>>, vector<256x128xbf16>
    %cst_18 = arith.constant dense<0.000000e+00> : vector<8x128xf32>
    %36 = tpu.matmul %34, %35, %cst_18 {dimension_numbers = #tpu.dot_dimension_numbers<[1], [0], [0], [1], [0, 0, 1, 1], [], []>} : vector<8x256xbf16>, vector<256x128xbf16>, vector<8x128xf32> -> vector<8x128xf32>
    %37 = arith.addf %33, %36 : vector<8x128xf32>
    %c0_19 = arith.constant 0 : index
    %c0_20 = arith.constant 0 : index
    %38 = vector.load %arg7[%c0_19, %c0_20] : memref<8x128xf32, #tpu.memory_space<vmem>>, vector<8x128xf32>
    tpu.vector_store %arg7[%c0_19, %c0_20], %37 {strides = array<i32>} : memref<8x128xf32, #tpu.memory_space<vmem>>, vector<8x128xf32>,
    %c1_i32 = arith.constant 1 : i32
    %39 = arith.cmpi eq, %arg1, %c1_i32 : i32
    %40 = arith.extui %39 : i1 to i32
    %c0_i32_21 = arith.constant 0 : i32
    %41 = arith.cmpi ne, %40, %c0_i32_21 : i32
    scf.if %41 {
      %c0_22 = arith.constant 0 : index
      %c0_23 = arith.constant 0 : index
      %42 = vector.load %arg7[%c0_22, %c0_23] : memref<8x128xf32, #tpu.memory_space<vmem>>, vector<8x128xf32>
      %c0_24 = arith.constant 0 : index
      %c0_25 = arith.constant 0 : index
      %43 = vector.load %arg6[%c0_24, %c0_25] : memref<1x128xf32, #tpu.memory_space<vmem>>, vector<1x128xf32>
      %44 = vector.broadcast %43 : vector<1x128xf32> to vector<8x128xf32>
      %45 = arith.addf %42, %44 : vector<8x128xf32>
      %c0_26 = arith.constant 0 : index
      %c0_27 = arith.constant 0 : index
      %46 = vector.load %arg7[%c0_26, %c0_27] : memref<8x128xf32, #tpu.memory_space<vmem>>, vector<8x128xf32>
      tpu.vector_store %arg7[%c0_26, %c0_27], %45 {strides = array<i32>} : memref<8x128xf32, #tpu.memory_space<vmem>>, vector<8x128xf32>,
    } else {
    }
    return
  }
  func.func @transform_0(%arg0: i32, %arg1: i32) -> (i32, i32) {
    %c0_i32 = arith.constant 0 : i32
    %c0_i32_0 = arith.constant 0 : i32
    %c0_i32_1 = arith.constant 0 : i32
    return %c0_i32, %c0_i32_0 : i32, i32
  }
  func.func @transform_1(%arg0: i32, %arg1: i32) -> (i32, i32) {
    %c0_i32 = arith.constant 0 : i32
    %c0_i32_0 = arith.constant 0 : i32
    return %c0_i32, %arg1 : i32, i32
  }
  func.func @transform_2(%arg0: i32, %arg1: i32) -> (i32, i32) {
    %c0_i32 = arith.constant 0 : i32
    %c0_i32_0 = arith.constant 0 : i32
    return %c0_i32, %arg1 : i32, i32
  }
  func.func @transform_3(%arg0: i32, %arg1: i32) -> (i32, i32) {
    %c0_i32 = arith.constant 0 : i32
    return %arg1, %arg0 : i32, i32
  }
  func.func @transform_4(%arg0: i32, %arg1: i32) -> (i32, i32) {
    %c0_i32 = arith.constant 0 : i32
    %c0_i32_0 = arith.constant 0 : i32
    return %c0_i32, %arg0 : i32, i32
  }
  func.func @transform_5(%arg0: i32, %arg1: i32) -> (i32, i32) {
    %c0_i32 = arith.constant 0 : i32
    %c0_i32_0 = arith.constant 0 : i32
    return %c0_i32, %arg0 : i32, i32
  }
}

</mosaic_0001>

<bundles_post_ra>
// kernel: mlp_forward.1
= control target key start
LH: loop header
LB: loop body
LE: loop exit
PB: predicated region body
PF: predicated region fallthrough
CT: control target
= control target key end

     0   :  { %s2231_s0 = inlined_call_operand.hbm [shape: bf16[8,256], index: 0, kind: input, shape index: {}]   ;;  %s2232_s1 = inlined_call_operand.hbm [shape: bf16[256,512], index: 1, kind: input, shape index: {}]   ;;  %s2233_s2 = inlined_call_operand.hbm [shape: f32[2,512], index: 2, kind: input, shape index: {}]   ;;  %s2234_s3 = inlined_call_operand.hbm [shape: bf16[512,256], index: 3, kind: input, shape index: {}]   ;;  %s2235_s4 = inlined_call_operand.vmem [shape: f32[1,256], index: 4, kind: input, shape index: {}]   ;;  %s2236_s5 = inlined_call_operand.hbm [shape: f32[8,256], index: 5, kind: output, shape index: {}]  }
   0x1   :  { %2252 = sst [smem:[#allocation25_spill]] %s2231_s0 }
   0x2   :  { %2253 = sst [smem:[#allocation26_spill]] %s2232_s1 }
   0x3   :  { %2254 = sst [smem:[#allocation27_spill]] %s2233_s2 }
   0x4   :  { %2255 = sst [smem:[#allocation28_spill]] %s2235_s4 }
   0x5   :  { %2256 = sst [smem:[#allocation29_spill]] %s2236_s5 }
   0x6   :  { %10 = vsyncpa [#allocation3], 0 }
   0x7   :  { %11 = vsyncpa [#allocation6], 0 }
   0x8   :  { %13 = vsyncpa [#allocation6 + $0x1], 0 }
   0x9   :  { %14 = vsyncpa [#allocation9], 0 }
   0xa   :  { %16 = vsyncpa [#allocation9 + $0x1], 0 }
   0xb   :  { %17 = vsyncpa [#allocation4], 0 }
   0xc   :  { %19 = vsyncpa [#allocation4 + $0x1], 0  ;;  %s1796_s18 = smov 0   ;;  %s1798_s19 = smov 0  }
   0xd   :  { %s1800_s20 = smov 0   ;;  %s1802_s21 = smov 0  }
   0xe   :  { %s1804_s22 = smov 0   ;;  %s1806_s23 = smov 0  }
   0xf   :  { %s1808_s24 = smov 0   ;;  %s1810_s25 = smov 0  }
  0x10   :  { %s1812_s26 = smov 0   ;;  %s1814_s27 = smov 0  }
  0x11   :  { %s1816_s28 = smov 0   ;;  %s1818_s29 = smov 0  }
  0x12   :  { %s1820_s30 = smov 0   ;;  %s1822_s6 = smov 0  }
  0x13 LB: > { %2257 = sst [smem:[#allocation15_spill]] %s1705_s18  ;;  %s34_s7 = sadd.s32 1, %s1749_s29  ;;  %s1757_s6 = sphi %s1822_s6, %s25_s6   ;;  %s1753_s30 = sphi %s1820_s30, %s2311_s30   ;;  %s1749_s29 = sphi %s1818_s29, %s2310_s29   ;;  %s1745_s28 = sphi %s1816_s28, %s2309_s28   ;;  %s1741_s27 = sphi %s1814_s27, %s2308_s27   ;;  %s1737_s26 = sphi %s1812_s26, %s2299_s26   ;;  %s1733_s25 = sphi %s1810_s25, %s2307_s25   ;;  %s1729_s24 = sphi %s1808_s24, %s2306_s24   ;;  %s1725_s23 = sphi %s1806_s23, %s2305_s23   ;;  %s1721_s22 = sphi %s1804_s22, %s2304_s22   ;;  %s1717_s21 = sphi %s1802_s21, %s2303_s21   ;;  %s1713_s20 = sphi %s1800_s20, %s2302_s20   ;;  %s1709_s19 = sphi %s1798_s19, %s2301_s19   ;;  %s1705_s18 = sphi %s1796_s18, %s2297_s18  }
  0x14   : > { %2258 = sst [smem:[#allocation16_spill]] %s1709_s19  ;;  %s65_s8 = sadd.s32 1, %s1737_s26 }
  0x15   : > { %2259 = sst [smem:[#allocation17_spill]] %s1737_s26  ;;  %p1868_p0 = scmp.ge.s32.totalorder %s34_s7, 2 }
  0x16   : > { %2260 = sst [smem:[#allocation18_spill]] %s1741_s27  ;;  %p72_p1 = scmp.ne.s32.totalorder %s1737_s26, %s1733_s25 }
  0x17   : > { %2261 = sst [smem:[#allocation19_spill]] %s1745_s28  ;;  %p2241_p2 = scmp.eq.s32.totalorder %s1757_s6, 0 }
  0x18   : > { %s2313_s7 = smov (%p1868_p0, %s34_s7), 0  ;;  %p2240_p4 = scmp.lt.s32.totalorder %s1757_s6, 4 }
  0x19   : > { %2263 = sst [smem:[#allocation20_spill]] %s2313_s7  ;;  %p1881_p3 = por %p2241_p2, %p72_p1 }
  0x1a   : > { %s1888_s11 = ssub.s32 %s1749_s29, %s2313_s7  ;;  %s220_s12 = sand.u32 1, %s1757_s6  }
  0x1b   : > { %p63_p5 = scmp.eq.s32.totalorder %s1888_s11, 0  ;;  %s222_s13 = sand.u32 1, %s1737_s26  }
  0x1c   : > { %s1274_s14 = sshll.u32 %s1749_s29, 3  ;;  %s1059_s16 = sshll.u32 %s222_s13, 8 }
  0x1d   : > { %s1895_s15 = scalar_select %p63_p5, %s1737_s26, %s65_s8  }
  0x1e   : > { %s2266_s1 = sld [smem:[#allocation26_spill]]  ;;  %s224_s4 = scalar_lea.vmem [#allocation5], %s1059_s16 }
  0x1f   : > { %2265 = sst [smem:[#allocation21_spill]] %s1895_s15  ;;  %s232_s28 = sshll.u32 %s224_s4, 4  ;;  %s233_s28 = int_to_ptr.vmem [resolvable:$true] %s232_s28 }
  0x20   : > { %p1906_p6 = pnand %p2240_p4, %p1881_p3  ;;  %s1910_s5 = scalar_lea.sflag [#allocation6], %s220_s12 }
  0x21   : > { %s1761_s16 = smov 8   ;;  %s1917_s4 = sadd.s32 4294967295, %s1757_s6  }
  0x22   : > { %s1055_s10 = sadd.s32 4294967294, %s1757_s6   ;;  %p78_p7 = scmp.ne.s32.totalorder %s1733_s25, %s1729_s24 }
  0x23   : > { %p79_p8 = scmp.eq.s32.totalorder %s1917_s4, 0  ;;  %p132_p9 = scmp.ne.s32.totalorder %s1721_s22, %s1717_s21 }
  0x24   : > { %s229_s27 = scalar_lea.hbm %s2266_s1, %s1274_s14  ;;  %s2242_s14 = smov 128  }
  0x25   : > { %s230_s7 = sshll.u32 %s229_s27, 4  ;;  %s1759_s27 = smov 256   ;;  %s231_s7 = int_to_ptr.hbm [resolvable:$true] %s230_s7 }
  0x26   : > { %1344 = dma.hbm_to_vmem [thread:$0]  (!%p1906_p6), %s231_s7, 4096, %s233_s28, %s1910_s5, %s1759_s27, %s2242_s14, %s1761_s16  }
  0x27   : > { %p1928_p10 = por %p79_p8, %p78_p7  ;;  %p181_p11 = scmp.ne.s32.totalorder %s1713_s20, %s1709_s19 }
  0x28   : > { %p1936_p12 = por %p132_p9, %p79_p8  ;;  %p182_p13 = scmp.eq.s32.totalorder %s1917_s4, 3 }
  0x29   : > { %p187_p1 = scmp.ne.s32.totalorder %s1709_s19, %s1705_s18  ;;  %p188_p3 = scmp.eq.s32.totalorder %s1055_s10, 3 }
  0x2a   : > { %s2269_s28 = scalar_select %p1936_p12, 1, 0 }
  0x2b   : > { %p1943_p5 = por %p182_p13, %p181_p11  ;;  %p1056_p4 = scmp.ge.s32.totalorder %s1757_s6, 1 }
  0x2c   : > { %2270 = sst [smem:[#allocation22_spill]] %s2269_s28  ;;  %p1948_p7 = por %p188_p3, %p187_p1 }
  0x2d   : > { %s2271_s24 = scalar_select %p1943_p5, 1, 0 }
  0x2e   : > { %s2273_s21 = scalar_select %p1948_p7, 1, 0 }
  0x2f   : > { %2272 = sst [smem:[#allocation23_spill]] %s2271_s24  ;;  %p195_p2 = scmp.lt.s32.totalorder %s1757_s6, 5 }
  0x30   : > { %2274 = sst [smem:[#allocation24_spill]] %s2273_s21  ;;  %s1062_s10 = sshll.u32 %s222_s13, 2 }
  0x31   : > { %s2275_s0 = sld [smem:[#allocation25_spill]]  ;;  %p1956_p9 = pnand %p1056_p4, %p195_p2 }
  0x32   : > { %s1762_s12 = smov [#allocation2]   ;;  %s1275_s27 = sshll.u32 %s1749_s29, 2 }
  0x33   : > { %p1337_p11 = pneg %p1956_p9  ;;  %s209_s7 = sshll.u32 %s1762_s12, 4  ;;  %s210_s7 = int_to_ptr.vmem [resolvable:$true] %s209_s7 }
  0x34   : > { %s2277_s2 = sld [smem:[#allocation27_spill]]  ;;  %s246_s13 = scalar_lea.vmem [#allocation7], %s1062_s10 }
  0x35   : > { %p1338_p2 = pnand %p1337_p11, %p79_p8  ;;  %s255_s26 = sshll.u32 %s246_s13, 4  ;;  %s256_s26 = int_to_ptr.vmem [resolvable:$true] %s255_s26 }
  0x36   : > { %s37_s12 = sadd.s32 1, %s1753_s30  ;;  %s119_s18 = sadd.s32 1, %s1725_s23 }
  0x37   : > { %s207_s16 = sshll.u32 %s2275_s0, 4  ;;  %s2315_s12 = smov (!%p1868_p0, %s37_s12), %s1753_s30  ;;  %s208_s16 = int_to_ptr.hbm [resolvable:$true] %s207_s16 }
  0x38   : > { %1340 = dma.hbm_to_vmem [thread:$0]  (!%p1338_p2), %s208_s16, 128, %s210_s7, [#allocation3]  }
  0x39   : > { %p126_p4 = scmp.ne.s32.totalorder %s1725_s23, %s1721_s22  ;;  %s262_s0 = sand.u32 1, %s1725_s23  }
  0x3a   : > { %s251_s15 = scalar_lea.hbm %s2277_s2, %s1275_s27  ;;  %p39_p13 = scmp.ge.s32.totalorder %s2315_s12, 2 }
  0x3b   : > { %s253_s21 = sshll.u32 %s251_s15, 4  ;;  %p2278_p1 = scmp.eq.s32.totalorder %s1757_s6, 0  ;;  %s254_s21 = int_to_ptr.hbm [resolvable:$true] %s253_s21 }
  0x3c   : > { %1347 = dma.hbm_to_vmem [thread:$0]  (!%p1906_p6), %s254_s21, 64, %s256_s26, %s1910_s5  }
  0x3d   : > { %p1983_p3 = por %p126_p4, %p2278_p1  ;;  %s1065_s15 = sshll.u32 %s262_s0, 7 }
  0x3e   : > { %s2317_s12 = smov (%p39_p13, %s2315_s12), 0  ;;  %s1276_s26 = sshll.u32 %s1749_s29, 6 }
  0x3f   : > { %s115_s8 = ssub.s32 %s1753_s30, %s2317_s12  ;;  %s271_s5 = sadd.s32 %s1753_s30, %s1276_s26 }
  0x40   : > { %s116_s9 = sor.u32 %s115_s8, %s1888_s11  ;;  %p169_p6 = scmp.eq.s32.totalorder %s115_s8, 0 }
  0x41   : > { %p117_p0 = scmp.eq.s32.totalorder %s116_s9, 0  ;;  %s1068_s21 = sshll.u32 %s271_s5, 2 }
  0x42   : > { %s2280_s16 = sadd.s32 1, %s1713_s20  ;;  %s273_s2 = scalar_lea.hbm %s2234_s3, %s1068_s21 }
  0x43   : > { %s1997_s10 = scalar_select %p169_p6, %s1713_s20, %s2280_s16  }
  0x44   : > { %s2000_s7 = scalar_select %p117_p0, %s1725_s23, %s119_s18  }
  0x45   : > { %s266_s24 = scalar_lea.vmem [#allocation8], %s1065_s15  ;;  %s274_s28 = sshll.u32 %s273_s2, 4  ;;  %s275_s28 = int_to_ptr.hbm [resolvable:$true] %s274_s28 }
  0x46   : > { %s276_s19 = sshll.u32 %s266_s24, 4  ;;  %p2281_p11 = scmp.lt.s32.totalorder %s1757_s6, 4  ;;  %s277_s19 = int_to_ptr.vmem [resolvable:$true] %s276_s19 }
  0x47   : > { %s263_s11 = scalar_lea.sflag [#allocation9], %s262_s0  ;;  %s1763_s26 = smov 64  }
  0x48   : > { %p1348_p2 = pnand %p2281_p11, %p1983_p3  ;;  %s1764_s8 = smov 4  }
  0x49   : > { %s2282_s5 = smov 128   ;;  %294 = sbr.rel (%p1956_p9) target bundleno = 499 (0x1f3), region = 40 }
  0x4a   : > { %1350 = dma.hbm_to_vmem [thread:$0]  (!%p1348_p2), %s275_s28, 2048, %s277_s19, %s263_s11, %s2282_s5, %s1763_s26, %s1764_s8  }
  0x4e   : > { %1688 = dma.done.wait (%p79_p8), [#allocation3], 128  }
  0x4f   : > { %1690 = vsyncadd (%p79_p8), [#allocation3], 4294967168  ;;  %s301_s2 = sand.u32 1, %s1917_s4   ;;  %s303_s18 = sand.u32 1, %s1733_s25  }
  0x50   : > { %s1071_s24 = sshll.u32 %s303_s18, 8  ;;  %s302_s0 = scalar_lea.sflag [#allocation6], %s301_s2 }
  0x51   : > { %s2018_s1 = scalar_lea.vmem [#allocation5], %s1071_s24 }
  0x52   : > { %1692 = dma.done.wait (%p1928_p10), %s302_s0, 4160  }
  0x53   : > { %1694 = vsyncadd (%p1928_p10), %s302_s0, 4294963136  ;;  %s2024_s14 = sshll.u32 %s303_s18, 2  ;;  %s321_s28 = sand.u32 1, %s1721_s22  }
  0x54   : > { %s1073_s15 = sshll.u32 %s321_s28, 7  ;;  %s315_s9 = scalar_lea.vmem [#allocation7], %s2024_s14 }
  0x55   : > { %s322_s21 = scalar_lea.sflag [#allocation9], %s321_s28  ;;  %s2028_s4 = scalar_lea.vmem [#allocation8], %s1073_s15 }
  0x56   : > { %1696 = dma.done.wait (%p1936_p12), %s322_s21, 2048  }
  0x57   : > { %1698 = vsyncadd (%p1936_p12), %s322_s21, 4294965248  ;;  %s2284_s16 = sld [smem:[#allocation16_spill]] }
  0x58   : > { %s2285_s27 = sld [smem:[#allocation19_spill]] }
  0x59   : > { %s2286_s8 = sld [smem:[#allocation28_spill]] }
  0x5a   : > { %s2287_s18 = sld [smem:[#allocation18_spill]] }
  0x5d   : > { %s363_s17 = sand.u32 1, %s2284_s16  }
  0x5e   : > { %p369_p8 = scmp.lt.s32.totalorder %s2285_s27, 1  ;;  %s1074_s13 = sshll.u32 %s363_s17, 3 }
  0x5f   : > { %s2045_s2 = scalar_lea.vmem [#allocation10], %s1074_s13 }
  0x60   : > { %s2319_s27 = smov (!%p369_p8, %s2285_s27), 1  ;;  %p1075_p10 = scmp.ne.s32.totalorder %s2287_s18, 0 }
  0x61   : > { %s371_s5 = scalar_lea.vmem %s2286_s8, %s2319_s27 }
  0x62   : > { %375 = sbr.rel (%p1075_p10) target bundleno = 105 (0x69), region = 60 }
  0x67   : > { %v1765_v0 = vmov 0.0  }
  0x68   : > { %376 = vst [vmem:[%s2045_s2] sm:$0xff] %v1765_v0 }
  0x69 PF: > { %v1134_v1 = vld [vmem:[%s2018_s1 + $0x70] sm:$0xf]  ;;  %v1292_v2 = vld [vmem:[%s2018_s1 + $0x74] sm:$0xf0]  ;;  %v1291_v6 = vld [vmem:[%s2018_s1 + $0x74] sm:$0xf] }
  0x6a   : > { %v1198_v3 = vld [vmem:[%s2018_s1 + $0xf0] sm:$0xf]  ;;  %v1135_v4 = vor.u32 %v1292_v2, %v1134_v1  ;;  %v1308_v5 = vld [vmem:[%s2018_s1 + $0xf4] sm:$0xf0]  ;;  %v1136_v7 = vld [vmem:[%s2018_s1 + $0x78] sm:$0xf0] }
  0x6b   : > { %v1199_v8 = vor.u32 %v1308_v5, %v1198_v3  ;;  %v1139_v9 = vor.u32 %v1291_v6, %v1136_v7  ;;  %v1307_v10 = vld [vmem:[%s2018_s1 + $0xf4] sm:$0xf]  ;;  %v1200_v11 = vld [vmem:[%s2018_s1 + $0xf8] sm:$0xf0]  ;;  %v1126_v12 = vld [vmem:[%s2018_s1 + $0x60] sm:$0xf] }
  0x6c   : > { %577 = vmatpush.bf16.msra.mxu0 %v1135_v4  ;;  %v1203_v13 = vor.u32 %v1307_v10, %v1200_v11  ;;  %v1290_v14 = vld [vmem:[%s2018_s1 + $0x64] sm:$0xf0]  ;;  %v1190_v15 = vld [vmem:[%s2018_s1 + $0xe0] sm:$0xf]  ;;  %v1289_v19 = vld [vmem:[%s2018_s1 + $0x64] sm:$0xf] }
  0x6d   : > { %v1306_v16 = vld [vmem:[%s2018_s1 + $0xe4] sm:$0xf0]  ;;  %590 = vmatpush.bf16.msra.mxu1 %v1199_v8  ;;  %603 = vmatpush.bf16.msra.mxu2 %v1139_v9  ;;  %v1127_v17 = vor.u32 %v1290_v14, %v1126_v12  ;;  %v1128_v20 = vld [vmem:[%s2018_s1 + $0x68] sm:$0xf0]  ;;  %v1305_v21 = vld [vmem:[%s2018_s1 + $0xe4] sm:$0xf] }
  0x6e   : > { %v1191_v18 = vor.u32 %v1306_v16, %v1190_v15  ;;  %616 = vmatpush.bf16.msra.mxu3 %v1203_v13  ;;  %v1131_v22 = vor.u32 %v1289_v19, %v1128_v20  ;;  %v1192_v23 = vld [vmem:[%s2018_s1 + $0xe8] sm:$0xf0]  ;;  %v1118_v24 = vld [vmem:[%s2018_s1 + $0x50] sm:$0xf]  ;;  %v1288_v25 = vld [vmem:[%s2018_s1 + $0x54] sm:$0xf0] }
  0x6f   : > { %v1195_v26 = vor.u32 %v1305_v21, %v1192_v23  ;;  %v1182_v27 = vld [vmem:[%s2018_s1 + $0xd0] sm:$0xf]  ;;  %v1304_v28 = vld [vmem:[%s2018_s1 + $0xd4] sm:$0xf0]  ;;  %v1287_v29 = vld [vmem:[%s2018_s1 + $0x54] sm:$0xf]  ;;  %v1119_v30 = vor.u32 %v1288_v25, %v1118_v24 }
  0x70   : > { %578 = vmatpush.bf16.msra.mxu0 %v1127_v17  ;;  %v1120_v31 = vld [vmem:[%s2018_s1 + $0x58] sm:$0xf0]  ;;  %v1303_v32 = vld [vmem:[%s2018_s1 + $0xd4] sm:$0xf]  ;;  %v1183_v34 = vor.u32 %v1304_v28, %v1182_v27  ;;  %v1110_v36 = vld [vmem:[%s2018_s1 + $0x40] sm:$0xf] }
  0x71   : > { %v1184_v33 = vld [vmem:[%s2018_s1 + $0xd8] sm:$0xf0]  ;;  %591 = vmatpush.bf16.msra.mxu1 %v1191_v18  ;;  %604 = vmatpush.bf16.msra.mxu2 %v1131_v22  ;;  %v1123_v35 = vor.u32 %v1287_v29, %v1120_v31  ;;  %v1286_v37 = vld [vmem:[%s2018_s1 + $0x44] sm:$0xf0]  ;;  %v1174_v38 = vld [vmem:[%s2018_s1 + $0xc0] sm:$0xf] }
  0x72   : > { %617 = vmatpush.bf16.msra.mxu3 %v1195_v26  ;;  %v1187_v39 = vor.u32 %v1303_v32, %v1184_v33  ;;  %v1302_v40 = vld [vmem:[%s2018_s1 + $0xc4] sm:$0xf0]  ;;  %v1285_v41 = vld [vmem:[%s2018_s1 + $0x44] sm:$0xf]  ;;  %v1112_v42 = vld [vmem:[%s2018_s1 + $0x48] sm:$0xf0]  ;;  %v1111_v45 = vor.u32 %v1286_v37, %v1110_v36 }
  0x73   : > { %v1301_v43 = vld [vmem:[%s2018_s1 + $0xc4] sm:$0xf]  ;;  %v1176_v44 = vld [vmem:[%s2018_s1 + $0xc8] sm:$0xf0]  ;;  %v1175_v46 = vor.u32 %v1302_v40, %v1174_v38  ;;  %v1115_v47 = vor.u32 %v1285_v41, %v1112_v42  ;;  %v1102_v48 = vld [vmem:[%s2018_s1 + $0x30] sm:$0xf] }
  0x74   : > { %579 = vmatpush.bf16.msra.mxu0 %v1119_v30  ;;  %v1284_v49 = vld [vmem:[%s2018_s1 + $0x34] sm:$0xf0]  ;;  %v1166_v50 = vld [vmem:[%s2018_s1 + $0xb0] sm:$0xf]  ;;  %v1179_v51 = vor.u32 %v1301_v43, %v1176_v44  ;;  %v1283_v53 = vld [vmem:[%s2018_s1 + $0x34] sm:$0xf] }
  0x75   : > { %592 = vmatpush.bf16.msra.mxu1 %v1183_v34  ;;  %605 = vmatpush.bf16.msra.mxu2 %v1123_v35  ;;  %v1300_v52 = vld [vmem:[%s2018_s1 + $0xb4] sm:$0xf0]  ;;  %v1104_v54 = vld [vmem:[%s2018_s1 + $0x38] sm:$0xf0]  ;;  %v1299_v55 = vld [vmem:[%s2018_s1 + $0xb4] sm:$0xf]  ;;  %v1103_v57 = vor.u32 %v1284_v49, %v1102_v48 }
  0x76   : > { %618 = vmatpush.bf16.msra.mxu3 %v1187_v39  ;;  %v1168_v56 = vld [vmem:[%s2018_s1 + $0xb8] sm:$0xf0]  ;;  %v1167_v58 = vor.u32 %v1300_v52, %v1166_v50  ;;  %v1107_v59 = vor.u32 %v1283_v53, %v1104_v54  ;;  %v1094_v60 = vld [vmem:[%s2018_s1 + $0x20] sm:$0xf]  ;;  %v1282_v61 = vld [vmem:[%s2018_s1 + $0x24] sm:$0xf0] }
  0x77   : > { %v1158_v62 = vld [vmem:[%s2018_s1 + $0xa0] sm:$0xf]  ;;  %v1171_v63 = vor.u32 %v1299_v55, %v1168_v56  ;;  %v1298_v0 = vld [vmem:[%s2018_s1 + $0xa4] sm:$0xf0]  ;;  %v1281_v1 = vld [vmem:[%s2018_s1 + $0x24] sm:$0xf]  ;;  %v1095_v5 = vor.u32 %v1282_v61, %v1094_v60 }
  0x78   : > { %580 = vmatpush.bf16.msra.mxu0 %v1111_v45  ;;  %v1096_v2 = vld [vmem:[%s2018_s1 + $0x28] sm:$0xf0]  ;;  %v1297_v3 = vld [vmem:[%s2018_s1 + $0xa4] sm:$0xf]  ;;  %v1159_v6 = vor.u32 %v1298_v0, %v1158_v62  ;;  %v1086_v8 = vld [vmem:[%s2018_s1 + $0x10] sm:$0xf] }
  0x79   : > { %593 = vmatpush.bf16.msra.mxu1 %v1175_v46  ;;  %606 = vmatpush.bf16.msra.mxu2 %v1115_v47  ;;  %v1160_v4 = vld [vmem:[%s2018_s1 + $0xa8] sm:$0xf0]  ;;  %v1099_v7 = vor.u32 %v1281_v1, %v1096_v2  ;;  %v1280_v9 = vld [vmem:[%s2018_s1 + $0x14] sm:$0xf0]  ;;  %v1150_v10 = vld [vmem:[%s2018_s1 + $0x90] sm:$0xf] }
  0x7a   : > { %619 = vmatpush.bf16.msra.mxu3 %v1179_v51  ;;  %v1163_v11 = vor.u32 %v1297_v3, %v1160_v4  ;;  %v1296_v12 = vld [vmem:[%s2018_s1 + $0x94] sm:$0xf0]  ;;  %v1279_v13 = vld [vmem:[%s2018_s1 + $0x14] sm:$0xf]  ;;  %v1088_v14 = vld [vmem:[%s2018_s1 + $0x18] sm:$0xf0]  ;;  %v1087_v17 = vor.u32 %v1280_v9, %v1086_v8 }
  0x7b   : > { %v1295_v15 = vld [vmem:[%s2018_s1 + $0x94] sm:$0xf]  ;;  %v1152_v16 = vld [vmem:[%s2018_s1 + $0x98] sm:$0xf0]  ;;  %v1151_v19 = vor.u32 %v1296_v12, %v1150_v10  ;;  %v1091_v20 = vor.u32 %v1279_v13, %v1088_v14  ;;  %v1078_v21 = vld [vmem:[%s2018_s1] sm:$0xf] }
  0x7c   : > { %581 = vmatpush.bf16.msra.mxu0 %v1103_v57  ;;  %v377_v18 = vld [vmem:[#allocation2] sm:$0xff]  ;;  %v1278_v22 = vld [vmem:[%s2018_s1 + $0x4] sm:$0xf0]  ;;  %v1142_v23 = vld [vmem:[%s2018_s1 + $0x80] sm:$0xf]  ;;  %v1155_v24 = vor.u32 %v1295_v15, %v1152_v16  ;;  %vm693_vm5 = vcmask 1040384  }
  0x7d   : > { %594 = vmatpush.bf16.msra.mxu1 %v1167_v58  ;;  %607 = vmatpush.bf16.msra.mxu2 %v1107_v59  ;;  %v1294_v25 = vld [vmem:[%s2018_s1 + $0x84] sm:$0xf0]  ;;  %v1277_v26 = vld [vmem:[%s2018_s1 + $0x4] sm:$0xf]  ;;  %v1080_v27 = vld [vmem:[%s2018_s1 + $0x8] sm:$0xf0]  ;;  %v411_v30 = vunpack.c.l.b16 %v377_v18  ;;  %v1079_v31 = vor.u32 %v1278_v22, %v1078_v21  ;;  %v412_v32 = vunpack.c.h.b16 %v377_v18 }
  0x7e   : > { %620 = vmatpush.bf16.msra.mxu3 %v1171_v63  ;;  %v1293_v28 = vld [vmem:[%s2018_s1 + $0x84] sm:$0xf]  ;;  %v1144_v29 = vld [vmem:[%s2018_s1 + $0x88] sm:$0xf0]  ;;  %v1143_v33 = vor.u32 %v1294_v25, %v1142_v23  ;;  %v1083_v34 = vor.u32 %v1277_v26, %v1080_v27  ;;  %v1315_v56 = vld [vmem:[%s2028_s4 + $0x30] sm:$0xff]  ;;  %s2288_s24 = sld [smem:[#allocation18_spill]] }
  0x7f   : > { %v1147_v35 = vor.u32 %v1293_v28, %v1144_v29  ;;  %v413_v36 = vpack.c.b16 %v411_v30, %v411_v30  ;;  %v414_v37 = vpack.c.b16 %v412_v32, %v412_v32  ;;  %v1316_v50 = vld [vmem:[%s2028_s4 + $0x38] sm:$0xff]  ;;  %v1323_v57 = vld [vmem:[%s2028_s4 + $0x70] sm:$0xff]  ;;  %v1314_v2 = vld [vmem:[%s2028_s4 + $0x28] sm:$0xff] }
  0x80   : > { %582 = vmatpush.bf16.msra.mxu0 %v1095_v5  ;;  %v1324_v51 = vld [vmem:[%s2028_s4 + $0x78] sm:$0xff]  ;;  %v1322_v3 = vld [vmem:[%s2028_s4 + $0x68] sm:$0xff]  ;;  %v1313_v13 = vld [vmem:[%s2028_s4 + $0x20] sm:$0xff] }
  0x81   : > { %595 = vmatpush.bf16.msra.mxu1 %v1159_v6  ;;  %608 = vmatpush.bf16.msra.mxu2 %v1099_v7  ;;  %v1321_v14 = vld [vmem:[%s2028_s4 + $0x60] sm:$0xff]  ;;  %v1312_v21 = vld [vmem:[%s2028_s4 + $0x18] sm:$0xff]  ;;  %v1311_v29 = vld [vmem:[%s2028_s4 + $0x10] sm:$0xff] }
  0x82   : > { %621 = vmatpush.bf16.msra.mxu3 %v1163_v11  ;;  %v1320_v22 = vld [vmem:[%s2028_s4 + $0x58] sm:$0xff]  ;;  %v1319_v30 = vld [vmem:[%s2028_s4 + $0x50] sm:$0xff] }
  0x84   : > { %583 = vmatpush.bf16.msra.mxu0 %v1087_v17  ;;  %p1269_p12 = scmp.ne.s32.totalorder %s2288_s24, 1 }
  0x85   : > { %596 = vmatpush.bf16.msra.mxu1 %v1151_v19  ;;  %609 = vmatpush.bf16.msra.mxu2 %v1091_v20 }
  0x86   : > { %622 = vmatpush.bf16.msra.mxu3 %v1155_v24 }
  0x88   : > { %584 = vmatpush.bf16.msra.mxu0 %v1079_v31 }
  0x89   : > { %597 = vmatpush.bf16.msra.mxu1 %v1143_v33  ;;  %610 = vmatpush.bf16.msra.mxu2 %v1083_v34  ;;  %v1310_v33 = vld [vmem:[%s2028_s4 + $0x8] sm:$0xff] }
  0x8a   : > { %623 = vmatpush.bf16.msra.mxu3 %v1147_v35  ;;  %v1318_v34 = vld [vmem:[%s2028_s4 + $0x48] sm:$0xff] }
  0x8b   : > { %585 = vmatmul.bf16.vlgmr.msra.gmra.mxu0 %v413_v36 }
  0x8c   : > { %598 = vmatmul.bf16.vlgmr.msra.gmra.mxu1 %v414_v37  ;;  %611 = vmatmul.bf16.vlgmr.msra.gmra.mxu2 %v413_v36 }
  0x8d   : > { %624 = vmatmul.bf16.vlgmr.msra.gmra.mxu3 %v414_v37  ;;  %852 = vmatpush.bf16.msrb.mxu0 %v1316_v50 }
  0x8e   : > { %865 = vmatpush.bf16.msrb.mxu1 %v1324_v51 }
  0x91   : > { %853 = vmatpush.bf16.msrb.mxu0 %v1315_v56 }
  0x92   : > { %866 = vmatpush.bf16.msrb.mxu1 %v1323_v57 }
  0x95   : > { %854 = vmatpush.bf16.msrb.mxu0 %v1314_v2 }
  0x96   : > { %867 = vmatpush.bf16.msrb.mxu1 %v1322_v3 }
  0x99   : > { %855 = vmatpush.bf16.msrb.mxu0 %v1313_v13  ;;  %v721_v13 = vld [vmem:[%s2045_s2] sm:$0xff] }
  0x9a   : > { %868 = vmatpush.bf16.msrb.mxu1 %v1321_v14 }
  0x9d   : > { %856 = vmatpush.bf16.msrb.mxu0 %v1312_v21 }
  0x9e   : > { %869 = vmatpush.bf16.msrb.mxu1 %v1320_v22 }
  0xa1   : > { %857 = vmatpush.bf16.msrb.mxu0 %v1311_v29 }
  0xa2   : > { %870 = vmatpush.bf16.msrb.mxu1 %v1319_v30 }
  0xa5   : > { %858 = vmatpush.bf16.msrb.mxu0 %v1310_v33 }
  0xa6   : > { %871 = vmatpush.bf16.msrb.mxu1 %v1318_v34 }
 0x108   : > { %v586_v38 = vpop.f32.mrf.mxu0 }
 0x109   : > { %v599_v39 = vpop.f32.mrf.mxu1 }
 0x10a   : > { %v2113_v40 = vadd.f32 %v599_v39, %v586_v38  ;;  %v1309_v38 = vld [vmem:[%s2028_s4] sm:$0xff] }
 0x10b   : > { %v1317_v39 = vld [vmem:[%s2028_s4 + $0x40] sm:$0xff]  ;;  %859 = vmatpush.bf16.msrb.mxu0 %v1309_v38 }
 0x10c   : > { %v629_v41 = vrot.slane %v2113_v40, 4  ;;  %v643_v42 = vmul.f32 %v2113_v40, %v2113_v40  ;;  %872 = vmatpush.bf16.msrb.mxu1 %v1317_v39 }
 0x10e   : > { %v630_v43 = vadd.f32 %v629_v41, %v2113_v40  ;;  %v645_v44 = vrot.slane %v643_v42, 4 }
 0x10f   : > { %v612_v45 = vpop.f32.mrf.mxu2 }
 0x110   : > { %v631_v46 = vrot.slane %v630_v43, 2  ;;  %v646_v47 = vadd.f32 %v645_v44, %v643_v42  ;;  %v625_v48 = vpop.f32.mrf.mxu3  ;;  %v588_v49 = vpop.f32.mrf.mxu0 }
 0x111   : > { %v2121_v52 = vadd.f32 %v625_v48, %v612_v45  ;;  %v601_v53 = vpop.f32.mrf.mxu1 }
 0x112   : > { %v632_v54 = vadd.f32 %v631_v46, %v630_v43  ;;  %v647_v55 = vrot.slane %v646_v47, 2  ;;  %v665_v53 = vld [vmem:[%s315_s9] ss:$2 sm:$0x3] }
 0x113   : > { %v635_v58 = vrot.slane %v2121_v52, 4  ;;  %v644_v59 = vmul.f32 %v2121_v52, %v2121_v52 }
 0x114   : > { %v633_v60 = vrot.slane %v632_v54, 1  ;;  %v648_v61 = vadd.f32 %v647_v55, %v646_v47 }
 0x115   : > { %v636_v62 = vadd.f32 %v635_v58, %v2121_v52  ;;  %v651_v63 = vrot.slane %v644_v59, 4 }
 0x116   : > { %v634_v0 = vadd.f32 %v633_v60, %v632_v54  ;;  %v649_v1 = vrot.slane %v648_v61, 1 }
 0x117   : > { %v637_v4 = vrot.slane %v636_v62, 2  ;;  %v652_v5 = vadd.f32 %v651_v63, %v644_v59  ;;  %v614_v6 = vpop.f32.mrf.mxu2 }
 0x118   : > { %v650_v7 = vadd.f32 %v649_v1, %v648_v61  ;;  %v627_v8 = vpop.f32.mrf.mxu3  ;;  %v2131_v9 = vmul.f32 0.125, %v634_v0  ;;  %v1204_v61 = vld [vmem:[%s315_s9 + $0x1] ss:$2 sm:$0x3] }
 0x119   : > { %v638_v10 = vadd.f32 %v637_v4, %v636_v62  ;;  %v653_v11 = vrot.slane %v652_v5, 2 }
 0x11a   : > { %v657_v12 = vmul.f32 0.125, %v650_v7  ;;  %v659_v15 = vmul.f32 %v2131_v9, %v2131_v9 }
 0x11b   : > { %v639_v16 = vrot.slane %v638_v10, 1  ;;  %v654_v17 = vadd.f32 %v653_v11, %v652_v5 }
 0x11c   : > { %v661_v18 = vsub.f32 %v657_v12, %v659_v15 }
 0x11d   : > { %v640_v19 = vadd.f32 %v639_v16, %v638_v10  ;;  %v655_v20 = vrot.slane %v654_v17, 1 }
 0x11e   : > { %v663_v23 = vmax.f32 %v661_v18, 0.0 }
 0x11f   : > { %v642_v24 = vmul.f32 0.125, %v640_v19  ;;  %v656_v25 = vadd.f32 %v655_v20, %v654_v17 }
 0x120   : > { %v668_v26 = vadd.f32 1e-05, %v663_v23 }
 0x121   : > { %v658_v27 = vmul.f32 0.125, %v656_v25  ;;  %v660_v28 = vmul.f32 %v642_v24, %v642_v24 }
 0x122   : > { %1478 = vrsqrt.f32 %v668_v26  ;;  %vm676_vm4 = vweird.f32 %v668_v26 }
 0x123   : > { %v662_v31 = vsub.f32 %v658_v27, %v660_v28 }
 0x125   : > { %v664_v32 = vmax.f32 %v662_v31, 0.0 }
 0x127   : > { %v669_v35 = vadd.f32 1e-05, %v664_v32 }
 0x128   : > { %v1479_v36 = vpop.eup %1478 }
 0x129   : > { %1480 = vrsqrt.f32 %v669_v35  ;;  %v671_v37 = vmul.f32 %v1479_v36, %v668_v26  ;;  %vm677_vm1 = vweird.f32 %v1479_v36  ;;  %vm686_vm2 = vweird.f32 %v669_v35 }
 0x12a   : > { %vm678_vm6 = vmor %vm676_vm4, %vm677_vm1 }
 0x12b   : > { %v672_v41 = vmul.f32 %v1479_v36, %v671_v37 }
 0x12d   : > { %v673_v44 = vmul.f32 0.5, %v672_v41 }
 0x12f   : > { %v1481_v42 = vpop.eup %1480  ;;  %v674_v46 = vsub.f32 1.5, %v673_v44 }
 0x130   : > { %v681_v43 = vmul.f32 %v1481_v42, %v669_v35  ;;  %vm687_vm0 = vweird.f32 %v1481_v42 }
 0x131   : > { %v675_v49 = vmul.f32 %v1479_v36, %v674_v46  ;;  %vm688_vm3 = vmor %vm686_vm2, %vm687_vm0 }
 0x132   : > { %v682_v45 = vmul.f32 %v1481_v42, %v681_v43 }
 0x133   : > { %v679_v55 = vsel %vm678_vm6, %v1479_v36, %v675_v49 }
 0x134   : > { %v683_v47 = vmul.f32 0.5, %v682_v45 }
 0x136   : > { %v684_v48 = vsub.f32 1.5, %v683_v47 }
 0x138   : > { %v685_v50 = vmul.f32 %v1481_v42, %v684_v48 }
 0x13a   : > { %v689_v51 = vsel %vm688_vm3, %v1481_v42, %v685_v50 }
 0x13b   : > { %v692_v54 = vrot.slane %v689_v51, 7 }
 0x13d   : > { %v694_v56 = vsel %vm693_vm5, %v679_v55, %v692_v54 }
 0x13e   : > { %v696_v57 = vmul.f32 %v694_v56, %v665_v53 }
 0x140   : > { %v698_v58 = vperm.slane %v696_v57, 0  ;;  %v699_v59 = vperm.slane %v696_v57, 1 }
 0x142   : > { %v703_v60 = vmul.f32 %v699_v59, %v642_v24  ;;  %v702_v62 = vmul.f32 %v698_v58, %v2131_v9  ;;  %v710_v2 = vmul.f32 %v698_v58, %v2113_v40  ;;  %v711_v4 = vmul.f32 %v699_v59, %v2121_v52 }
 0x144   : > { %v706_v63 = vrot.slane %v703_v60, 7 }
 0x146   : > { %v707_v0 = vsel %vm693_vm5, %v702_v62, %v706_v63 }
 0x147   : > { %v709_v1 = vsub.f32 %v1204_v61, %v707_v0 }
 0x149   : > { %v713_v3 = vperm.slane %v709_v1, 0  ;;  %v714_v5 = vperm.slane %v709_v1, 1 }
 0x14b   : > { %v717_v6 = vadd.f32 %v713_v3, %v710_v2  ;;  %v718_v7 = vadd.f32 %v714_v5, %v711_v4 }
 0x14d   : > { %v719_v8 = vmax.f32 %v717_v6, 0.0  ;;  %v720_v10 = vmax.f32 %v718_v7, 0.0 }
 0x14f   : > { %v722_v11 = vpack.c.bf16 %v719_v8, %v719_v8  ;;  %v723_v12 = vpack.c.bf16 %v720_v10, %v720_v10 }
 0x151   : > { %860 = vmatmul.bf16.vlgmr.msrb.gmra.mxu0 %v722_v11  ;;  %873 = vmatmul.bf16.vlgmr.msrb.gmra.mxu1 %v723_v12 }
 0x1ce   : > { %v861_v9 = vpop.f32.mrf.mxu0  ;;  %v874_v14 = vpop.f32.mrf.mxu1 }
 0x1cf   : > { %v875_v15 = vadd.f32 %v874_v14, %v861_v9 }
 0x1d1   : > { %v878_v16 = vadd.f32 %v875_v15, %v721_v13 }
 0x1d2   : > { %883 = sbr.rel (%p1269_p12) target bundleno = 478 (0x1de), region = 64 }
 0x1d3   : > { %879 = vst [vmem:[%s2045_s2] sm:$0xff] %v878_v16 }
 0x1d6   : > { %v863_v40 = vpop.f32.mrf.mxu0  ;;  %v876_v17 = vpop.f32.mrf.mxu1 }
 0x1d7   : > { %v1482_v18 = vld [vmem:[%s371_s5] ss:$0 sm:$0xff] }
 0x1da   : > { %v884_v52 = vld [vmem:[%s2045_s2] sm:$0xff] }
 0x1db   : > { %v889_v19 = vadd.f32 %v1482_v18, %v884_v52 }
 0x1dd   : > { %890 = vst [vmem:[%s2045_s2] sm:$0xff] %v889_v19 }
 0x1de PF: > { %s2290_s14 = sld [smem:[#allocation19_spill]]  ;;  %s904_s11 = sshll.u32 %s2045_s2, 4  ;;  %s905_s11 = int_to_ptr.vmem [resolvable:$true] %s904_s11 }
 0x1df   : > { %s2293_s16 = sld [smem:[#allocation29_spill]]  ;;  %s892_s8 = scalar_lea.sflag [#allocation4], %s363_s17 }
 0x1e4   : > { %s1271_s9 = sshll.u32 %s2290_s14, 3 }
 0x1e5   : > { %s902_s13 = scalar_lea.hbm %s2293_s16, %s1271_s9  ;;  %s1623_s0 = scalar_lea.hbm %s2293_s16, 16 }
 0x1e6   : > { %s906_s26 = sshll.u32 %s902_s13, 4  ;;  %s907_s26 = int_to_ptr.hbm [resolvable:$true] %s906_s26 }
 0x1e7   : > { %s1617_s27 = sshra.s32 %s907_s26, 4  ;;  %s1618_s27 = int_to_ptr.hbm [resolvable:$true] %s1617_s27 }
 0x1e8   : > { %s1619_s5 = scalar_lea.hbm %s1618_s27, 8  ;;  %p1624_p1 = scmp.lt.s32.totalorder %s1618_s27, %s2293_s16 }
 0x1e9   : > { %p1620_p9 = scmp.ne.s32.totalorder %s1618_s27, %s1619_s5  ;;  %p1625_p3 = scmp.lt.s32.totalorder %s1623_s0, %s1619_s5 }
 0x1eb   : > { %p1621_p4 = pnand %p1620_p9, %p1943_p5  ;;  %p1626_p6 = por %p1625_p3, %p1624_p1 }
 0x1ed   : > { %p1622_p13 = pneg %p1621_p4 }
 0x1ef   : > { %p1627_p0 = pnand %p1626_p6, %p1622_p13 }
 0x1f1   : > { %1630 = shalt.err (!%p1627_p0)
}
 0x1f2   : > { %1335 = dma.vmem_to_hbm [thread:$0]  (%p1943_p5), %s905_s11, 128, %s907_s26, %s892_s8  }
 0x1f3 PF: > { %s2294_s17 = sld [smem:[#allocation15_spill]]  ;;  %p1358_p11 = scmp.ge.s32.totalorder %s1757_s6, 2 }
 0x1f5   : > { %p1352_p2 = pnand %p1358_p11, %p1948_p7 }
 0x1f7   : > { %p1353_p8 = pneg %p1352_p2 }
 0x1f9   : > { %s918_s14 = sand.u32 1, %s2294_s17  }
 0x1fa   : > { %s919_s28 = scalar_lea.sflag [#allocation4], %s918_s14 }
 0x1fb   : > { %1700 = dma.done.wait (%p1353_p8), %s919_s28, 128  }
 0x1fc   : > { %1702 = vsyncadd (%p1353_p8), %s919_s28, 4294967168  ;;  %s25_s6 = sadd.s32 1, %s1757_s6   ;;  %s2297_s18 = sld [smem:[#allocation16_spill]] }
 0x1fd   : > { %p2184_p10 = scmp.ge.s32.totalorder %s25_s6, 6   ;;  %s2298_s15 = sld [smem:[#allocation17_spill]] }
 0x1fe   : > { %s2299_s26 = sld [smem:[#allocation21_spill]]  ;;  %s2301_s19 = smov %s1713_s20 }
 0x1ff   : > { %s2300_s4 = sld [smem:[#allocation20_spill]]  ;;  %s2302_s20 = smov %s1997_s10 }
 0x200   : > { %s2303_s21 = smov %s1721_s22  ;;  %s2304_s22 = smov %s1725_s23 }
 0x201   : > { %s2305_s23 = smov %s2000_s7  ;;  %s2306_s24 = smov %s1733_s25 }
 0x202   : > { %s2308_s27 = smov %s1749_s29  ;;  %s2309_s28 = smov %s1753_s30 }
 0x203   : > { %s2307_s25 = smov %s2298_s15  ;;  %s2311_s30 = smov %s2317_s12 }
 0x204   :  { %24 = sbr.rel (!%p2184_p10) target bundleno = 19 (0x13), region = 126 }
 0x205   : > { %s2310_s29 = smov %s2300_s4 }
 0x209   :  { %925 = vsyncpa [#allocation3], 1 }
 0x20a   :  { %927 = vsyncpa [#allocation3 + $0x1], 1 }
 0x20b   :  { %928 = vsyncpa [#allocation6], 1 }
 0x20c   :  { %930 = vsyncpa [#allocation6 + $0x1], 1 }
 0x20d   :  { %931 = vsyncpa [#allocation9], 1 }
 0x20e   :  { %933 = vsyncpa [#allocation9 + $0x1], 1 }
 0x20f   :  { %934 = vsyncpa [#allocation4], 1 }
 0x210   :  { %936 = vsyncpa [#allocation4 + $0x1], 1 }

</bundles_post_ra>
